<compile_context>
chip_gen: v5e
topology: v5e:2x2
jax: 0.10.0
libtpu: 0.0.40
codegen_flags: <defaults>
</compile_context>

<pallas_src>
import functools

import jax
import jax.numpy as jnp
from jax.experimental import pallas as pl
from jax.experimental.pallas import tpu as pltpu


def _default_lane_block():
    """256-lane blocks on v6e / v7x (2x256x256 MXU); 128 elsewhere (v5e etc.)."""
    try:
        kind = jax.devices()[0].device_kind.lower()
    except Exception:
        return 128
    if ("v6" in kind) or ("v7" in kind) or ("7x" in kind):
        return 256
    return 128


def _cox_loss_kernel(tri_ref, low_ref, data_ref, out_ref,
                     carry_ref, num_ref, cnt_ref, *, reduction):
    # tri_ref : (BLK, BLK)   f32, tri[j, i] = 1.0 if j <= i   (intra-row prefix)
    # low_ref : (ROWS, ROWS) f32, low[m, r] = 1.0 if r <  m   (cross-row prefix)
    # data_ref: (2, ROWS, BLK) f32; [0] = -pred (sorted desc. time), [1] = event
    # out_ref : (1, 1) f32 scalar loss
    # scratch : carry_ref / num_ref / cnt_ref (1,1) f32, persist across steps
    step = pl.program_id(0)

    @pl.when(step == 0)
    def _():
        carry_ref[...] = jnp.zeros_like(carry_ref)
        num_ref[...] = jnp.zeros_like(num_ref)
        cnt_ref[...] = jnp.zeros_like(cnt_ref)

    p = data_ref[0]                      # (ROWS, BLK)
    e = data_ref[1]                      # (ROWS, BLK)

    exp_p = jnp.exp(p)                   # EUP

    # Inclusive prefix sums within each row (lane axis): one MXU matmul.
    s = jnp.dot(exp_p, tri_ref[...], preferred_element_type=jnp.float32)   # (ROWS, BLK)
    # Sum of all elements in *previous* rows of this tile.
    t = jnp.dot(low_ref[...], exp_p, preferred_element_type=jnp.float32)   # (ROWS, BLK)
    prev_rows = jnp.sum(t, axis=1, keepdims=True)                          # (ROWS, 1)

    # Global cumulative sum = intra-row prefix + previous rows in this tile
    # + carry of all previous tiles.
    cs = s + (prev_rows + carry_ref[...])                                  # (ROWS, BLK)

    ls = p / jnp.log(cs)
    mask = e == 1.0
    masked_ls = jnp.where(mask, ls, 0.0)
    ones = jnp.where(mask, 1.0, 0.0)

    num_ref[...] += jnp.sum(jnp.sum(masked_ls, axis=1, keepdims=True),
                            axis=0, keepdims=True)
    cnt_ref[...] += jnp.sum(jnp.sum(ones, axis=1, keepdims=True),
                            axis=0, keepdims=True)

    # Carry the running total of exp(p) into the next tile.
    row_tot = jnp.sum(exp_p, axis=1, keepdims=True)                        # (ROWS, 1)
    carry_ref[...] += jnp.sum(row_tot, axis=0, keepdims=True)

    @pl.when(step == pl.num_programs(0) - 1)
    def _():
        num = num_ref[...]
        if reduction == "mean":
            out_ref[...] = -(num / cnt_ref[...])
        else:  # "sum"
            out_ref[...] = -num


def cox_loss(pred, target, reduction="mean", *, lane_block=None, chunk_elems=32768):
    """Matches CoxLoss.forward semantics.

    pred  : (N, 1) float
    target: (N, 2) float, [:, 0] = survival time, [:, 1] = event indicator
    """
    if reduction not in ("mean", "sum"):
        raise NotImplementedError("%s is not implemented." % reduction)

    # --- glue (plain JAX): negate, split target, descending argsort, gather ---
    p = -jnp.squeeze(pred, axis=-1).astype(jnp.float32)
    time = target[:, 0].astype(jnp.float32)
    event = target[:, 1].astype(jnp.float32)
    order = jnp.argsort(-time)              # descending time (stable)
    p_sorted = p[order]
    e_sorted = event[order]

    n = p_sorted.shape[0]
    blk = int(lane_block) if lane_block is not None else _default_lane_block()

    # Sublane rows per grid step: as large as `chunk_elems` allows, but clamped
    # to what N actually needs so small batches stay a single tiny tile.
    rows_cap = max(8, (chunk_elems // blk) // 8 * 8)
    rows_needed = -(-n // blk)                       # ceil(N / BLK)
    rows_needed = max(8, -(-rows_needed // 8) * 8)   # round up to multiple of 8
    rows = min(rows_cap, rows_needed)

    chunk = rows * blk
    n_chunks = max(1, -(-n // chunk))
    n_pad = n_chunks * chunk
    m_total = n_pad // blk

    # Pack (-pred, event) into one array -> single BlockSpec / DMA stream.
    data = jnp.zeros((2, n_pad), jnp.float32)
    data = data.at[0, :n].set(p_sorted).at[1, :n].set(e_sorted)
    data = data.reshape(2, m_total, blk)

    # Small constant prefix matrices, precomputed outside the kernel
    # (BLK x BLK and ROWS x ROWS -- O(1), not O(N^2)).
    tri = (jnp.arange(blk)[:, None] <= jnp.arange(blk)[None, :]).astype(jnp.float32)
    low = (jnp.arange(rows)[None, :] < jnp.arange(rows)[:, None]).astype(jnp.float32)

    kernel = functools.partial(_cox_loss_kernel, reduction=reduction)
    out = pl.pallas_call(
        kernel,
        out_shape=jax.ShapeDtypeStruct((1, 1), jnp.float32),
        grid_spec=pltpu.PrefetchScalarGridSpec(
            num_scalar_prefetch=0,
            grid=(n_chunks,),
            in_specs=[
                pl.BlockSpec((blk, blk), lambda i: (0, 0)),          # tri (resident)
                pl.BlockSpec((rows, rows), lambda i: (0, 0)),        # low (resident)
                pl.BlockSpec((2, rows, blk), lambda i: (0, i, 0)),   # packed data tile
            ],
            out_specs=pl.BlockSpec((1, 1), lambda i: (0, 0)),
            scratch_shapes=[
                pltpu.VMEM((1, 1), jnp.float32),   # cumulative-sum carry
                pltpu.VMEM((1, 1), jnp.float32),   # running numerator
                pltpu.VMEM((1, 1), jnp.float32),   # running event count
            ],
        ),
        compiler_params=pltpu.CompilerParams(
            dimension_semantics=("arbitrary",),    # sequential: carries state
        ),
    )(tri, low, data)
    return out[0, 0]


def _cox_loss_ref(pred, target, reduction="mean"):
    # pure-JAX reference mirroring the PyTorch code line-by-line
    p = -jnp.squeeze(pred, axis=-1).astype(jnp.float32)
    time = target[:, 0].astype(jnp.float32)
    event = target[:, 1].astype(jnp.float32)
    order = jnp.argsort(-time)
    p, event = p[order], event[order]
    cs = jnp.cumsum(jnp.exp(p))
    ls_all = p / jnp.log(cs)
    mask = event == 1
    num = jnp.sum(jnp.where(mask, ls_all, 0.0))
    cnt = jnp.sum(jnp.where(mask, 1.0, 0.0))
    return -(num / cnt) if reduction == "mean" else -num


if __name__ == "__main__":
    def make_inputs(key, n):
        k1, k2, k3 = jax.random.split(key, 3)
        pred = jax.random.normal(k1, (n, 1), dtype=jnp.float32)
        time = jax.random.uniform(k2, (n,), minval=0.5, maxval=10.0, dtype=jnp.float32)
        event = (jax.random.uniform(k3, (n,)) > 0.3).astype(jnp.float32)
        event = event.at[0].set(1.0)   # ensure at least one event
        target = jnp.stack([time, event], axis=1)
        return pred, target

    # Small case (single tiny tile thanks to the rows clamp), both reductions.
    pred, target = make_inputs(jax.random.PRNGKey(0), 8)
    for red in ("mean", "sum"):
        loss = cox_loss(pred, target, reduction=red)
        jax.block_until_ready(loss)
        expected = _cox_loss_ref(pred, target, reduction=red)
        assert jnp.allclose(loss, expected, rtol=1e-5, atol=1e-5), (red, loss, expected)

    # Medium case, default chunking (single grid step).
    pred2, target2 = make_inputs(jax.random.PRNGKey(1), 2500)
    loss2 = cox_loss(pred2, target2, reduction="mean")
    jax.block_until_ready(loss2)
    expected2 = _cox_loss_ref(pred2, target2, reduction="mean")
    assert jnp.allclose(loss2, expected2, rtol=1e-3, atol=1e-3), (loss2, expected2)

    # Same data with a small chunk size to force several sequential grid steps
    # and exercise the cross-tile cumulative-sum carry.
    loss3 = cox_loss(pred2, target2, reduction="mean", chunk_elems=1024)
    jax.block_until_ready(loss3)
    assert jnp.allclose(loss3, expected2, rtol=1e-3, atol=1e-3), (loss3, expected2)

    print("KERNEL_OK")
</pallas_src>

<mosaic_0001>
module attributes {stable_mosaic.version = 11 : i64} {
  func.func @_cox_loss_kernel(%arg0: i32, %arg1: memref<128x128xf32, #tpu.memory_space<vmem>>, %arg2: memref<8x8xf32, #tpu.memory_space<vmem>>, %arg3: memref<2x8x128xf32, #tpu.memory_space<vmem>>, %arg4: memref<1x1xf32, #tpu.memory_space<vmem>>, %arg5: memref<1x1xf32, #tpu.memory_space<vmem>>, %arg6: memref<1x1xf32, #tpu.memory_space<vmem>>, %arg7: memref<1x1xf32, #tpu.memory_space<vmem>>) attributes {dimension_semantics = [#tpu.dimension_semantics<arbitrary>], iteration_bounds = array<i64: 1>, scalar_prefetch = 0 : i64, scratch_operands = 3 : i64, tpu.core_type = #tpu.core_type<tc>, window_params = [{pipeline_mode = #tpu.pipeline_mode<synchronous>, transform_indices = @transform_0, window_bounds = array<i64: 128, 128>}, {pipeline_mode = #tpu.pipeline_mode<synchronous>, transform_indices = @transform_1, window_bounds = array<i64: 8, 8>}, {transform_indices = @transform_2, window_bounds = array<i64: 2, 8, 128>}, {pipeline_mode = #tpu.pipeline_mode<synchronous>, transform_indices = @transform_3, window_bounds = array<i64: 1, 1>}]} {
    %c0_i32 = arith.constant 0 : i32
    %0 = arith.cmpi eq, %arg0, %c0_i32 : i32
    %1 = arith.extui %0 : i1 to i32
    %c0_i32_0 = arith.constant 0 : i32
    %2 = arith.cmpi ne, %1, %c0_i32_0 : i32
    scf.if %2 {
      %cst_37 = arith.constant 0.000000e+00 : f32
      %52 = vector.broadcast %cst_37 : f32 to vector<1x1xf32>
      %c0_38 = arith.constant 0 : index
      %c0_39 = arith.constant 0 : index
      %53 = vector.load %arg5[%c0_38, %c0_39] : memref<1x1xf32, #tpu.memory_space<vmem>>, vector<1x1xf32>
      tpu.vector_store %arg5[%c0_38, %c0_39], %52 {strides = array<i32>} : memref<1x1xf32, #tpu.memory_space<vmem>>, vector<1x1xf32>,
      %cst_40 = arith.constant 0.000000e+00 : f32
      %54 = vector.broadcast %cst_40 : f32 to vector<1x1xf32>
      %c0_41 = arith.constant 0 : index
      %c0_42 = arith.constant 0 : index
      %55 = vector.load %arg6[%c0_41, %c0_42] : memref<1x1xf32, #tpu.memory_space<vmem>>, vector<1x1xf32>
      tpu.vector_store %arg6[%c0_41, %c0_42], %54 {strides = array<i32>} : memref<1x1xf32, #tpu.memory_space<vmem>>, vector<1x1xf32>,
      %cst_43 = arith.constant 0.000000e+00 : f32
      %56 = vector.broadcast %cst_43 : f32 to vector<1x1xf32>
      %c0_44 = arith.constant 0 : index
      %c0_45 = arith.constant 0 : index
      %57 = vector.load %arg7[%c0_44, %c0_45] : memref<1x1xf32, #tpu.memory_space<vmem>>, vector<1x1xf32>
      tpu.vector_store %arg7[%c0_44, %c0_45], %56 {strides = array<i32>} : memref<1x1xf32, #tpu.memory_space<vmem>>, vector<1x1xf32>,
    } else {
    }
    %c0 = arith.constant 0 : index
    %c0_1 = arith.constant 0 : index
    %c0_2 = arith.constant 0 : index
    %3 = vector.load %arg3[%c0, %c0_1, %c0_2] : memref<2x8x128xf32, #tpu.memory_space<vmem>>, vector<1x8x128xf32>
    %4 = vector.shape_cast %3 : vector<1x8x128xf32> to vector<8x128xf32>
    %c1 = arith.constant 1 : index
    %c0_3 = arith.constant 0 : index
    %c0_4 = arith.constant 0 : index
    %5 = vector.load %arg3[%c1, %c0_3, %c0_4] : memref<2x8x128xf32, #tpu.memory_space<vmem>>, vector<1x8x128xf32>
    %6 = vector.shape_cast %5 : vector<1x8x128xf32> to vector<8x128xf32>
    %7 = math.exp %4 : vector<8x128xf32>
    %c0_5 = arith.constant 0 : index
    %c0_6 = arith.constant 0 : index
    %8 = vector.load %arg1[%c0_5, %c0_6] : memref<128x128xf32, #tpu.memory_space<vmem>>, vector<128x128xf32>
    %cst = arith.constant dense<0.000000e+00> : vector<8x128xf32>
    %9 = tpu.matmul %7, %8, %cst {dimension_numbers = #tpu.dot_dimension_numbers<[1], [0], [0], [1], [0, 0, 1, 1], [], []>} : vector<8x128xf32>, vector<128x128xf32>, vector<8x128xf32> -> vector<8x128xf32>
    %c0_7 = arith.constant 0 : index
    %c0_8 = arith.constant 0 : index
    %10 = vector.load %arg2[%c0_7, %c0_8] : memref<8x8xf32, #tpu.memory_space<vmem>>, vector<8x8xf32>
    %cst_9 = arith.constant dense<0.000000e+00> : vector<8x128xf32>
    %11 = tpu.matmul %10, %7, %cst_9 {dimension_numbers = #tpu.dot_dimension_numbers<[1], [0], [0], [1], [0, 0, 1, 1], [], []>} : vector<8x8xf32>, vector<8x128xf32>, vector<8x128xf32> -> vector<8x128xf32>
    %cst_10 = arith.constant dense<0.000000e+00> : vector<8xf32>
    %12 = vector.multi_reduction <add>, %11, %cst_10 [1] : vector<8x128xf32> to vector<8xf32>
    %13 = vector.shape_cast %12 : vector<8xf32> to vector<8x1xf32>
    %c0_11 = arith.constant 0 : index
    %c0_12 = arith.constant 0 : index
    %14 = vector.load %arg5[%c0_11, %c0_12] : memref<1x1xf32, #tpu.memory_space<vmem>>, vector<1x1xf32>
    %15 = vector.broadcast %14 : vector<1x1xf32> to vector<8x1xf32>
    %16 = arith.addf %13, %15 : vector<8x1xf32>
    %17 = vector.broadcast %16 : vector<8x1xf32> to vector<8x128xf32>
    %18 = arith.addf %9, %17 : vector<8x128xf32>
    %19 = math.log %18 : vector<8x128xf32>
    %20 = arith.divf %4, %19 : vector<8x128xf32>
    %cst_13 = arith.constant 1.000000e+00 : f32
    %21 = vector.broadcast %cst_13 : f32 to vector<8x128xf32>
    %22 = arith.cmpf oeq, %6, %21 : vector<8x128xf32>
    %cst_14 = arith.constant 0.000000e+00 : f32
    %23 = vector.broadcast %cst_14 : f32 to vector<8x128xf32>
    %24 = arith.select %22, %20, %23 : vector<8x128xi1>, vector<8x128xf32>
    %cst_15 = arith.constant 1.000000e+00 : f32
    %cst_16 = arith.constant 0.000000e+00 : f32
    %25 = vector.broadcast %cst_15 : f32 to vector<8x128xf32>
    %26 = vector.broadcast %cst_16 : f32 to vector<8x128xf32>
    %27 = arith.select %22, %25, %26 : vector<8x128xi1>, vector<8x128xf32>
    %c0_17 = arith.constant 0 : index
    %c0_18 = arith.constant 0 : index
    %28 = vector.load %arg6[%c0_17, %c0_18] : memref<1x1xf32, #tpu.memory_space<vmem>>, vector<1x1xf32>
    %cst_19 = arith.constant dense<0.000000e+00> : vector<8xf32>
    %29 = vector.multi_reduction <add>, %24, %cst_19 [1] : vector<8x128xf32> to vector<8xf32>
    %30 = vector.shape_cast %29 : vector<8xf32> to vector<8x1xf32>
    %cst_20 = arith.constant dense<0.000000e+00> : vector<1xf32>
    %31 = vector.multi_reduction <add>, %30, %cst_20 [0] : vector<8x1xf32> to vector<1xf32>
    %32 = vector.shape_cast %31 : vector<1xf32> to vector<1x1xf32>
    %33 = arith.addf %28, %32 : vector<1x1xf32>
    %c0_21 = arith.constant 0 : index
    %c0_22 = arith.constant 0 : index
    %34 = vector.load %arg6[%c0_21, %c0_22] : memref<1x1xf32, #tpu.memory_space<vmem>>, vector<1x1xf32>
    tpu.vector_store %arg6[%c0_21, %c0_22], %33 {strides = array<i32>} : memref<1x1xf32, #tpu.memory_space<vmem>>, vector<1x1xf32>,
    %c0_23 = arith.constant 0 : index
    %c0_24 = arith.constant 0 : index
    %35 = vector.load %arg7[%c0_23, %c0_24] : memref<1x1xf32, #tpu.memory_space<vmem>>, vector<1x1xf32>
    %cst_25 = arith.constant dense<0.000000e+00> : vector<8xf32>
    %36 = vector.multi_reduction <add>, %27, %cst_25 [1] : vector<8x128xf32> to vector<8xf32>
    %37 = vector.shape_cast %36 : vector<8xf32> to vector<8x1xf32>
    %cst_26 = arith.constant dense<0.000000e+00> : vector<1xf32>
    %38 = vector.multi_reduction <add>, %37, %cst_26 [0] : vector<8x1xf32> to vector<1xf32>
    %39 = vector.shape_cast %38 : vector<1xf32> to vector<1x1xf32>
    %40 = arith.addf %35, %39 : vector<1x1xf32>
    %c0_27 = arith.constant 0 : index
    %c0_28 = arith.constant 0 : index
    %41 = vector.load %arg7[%c0_27, %c0_28] : memref<1x1xf32, #tpu.memory_space<vmem>>, vector<1x1xf32>
    tpu.vector_store %arg7[%c0_27, %c0_28], %40 {strides = array<i32>} : memref<1x1xf32, #tpu.memory_space<vmem>>, vector<1x1xf32>,
    %cst_29 = arith.constant dense<0.000000e+00> : vector<8xf32>
    %42 = vector.multi_reduction <add>, %7, %cst_29 [1] : vector<8x128xf32> to vector<8xf32>
    %43 = vector.shape_cast %42 : vector<8xf32> to vector<8x1xf32>
    %c0_30 = arith.constant 0 : index
    %c0_31 = arith.constant 0 : index
    %44 = vector.load %arg5[%c0_30, %c0_31] : memref<1x1xf32, #tpu.memory_space<vmem>>, vector<1x1xf32>
    %cst_32 = arith.constant dense<0.000000e+00> : vector<1xf32>
    %45 = vector.multi_reduction <add>, %43, %cst_32 [0] : vector<8x1xf32> to vector<1xf32>
    %46 = vector.shape_cast %45 : vector<1xf32> to vector<1x1xf32>
    %47 = arith.addf %44, %46 : vector<1x1xf32>
    %c0_33 = arith.constant 0 : index
    %c0_34 = arith.constant 0 : index
    %48 = vector.load %arg5[%c0_33, %c0_34] : memref<1x1xf32, #tpu.memory_space<vmem>>, vector<1x1xf32>
    tpu.vector_store %arg5[%c0_33, %c0_34], %47 {strides = array<i32>} : memref<1x1xf32, #tpu.memory_space<vmem>>, vector<1x1xf32>,
    %c0_i32_35 = arith.constant 0 : i32
    %49 = arith.cmpi eq, %arg0, %c0_i32_35 : i32
    %50 = arith.extui %49 : i1 to i32
    %c0_i32_36 = arith.constant 0 : i32
    %51 = arith.cmpi ne, %50, %c0_i32_36 : i32
    scf.if %51 {
      %c0_37 = arith.constant 0 : index
      %c0_38 = arith.constant 0 : index
      %52 = vector.load %arg6[%c0_37, %c0_38] : memref<1x1xf32, #tpu.memory_space<vmem>>, vector<1x1xf32>
      %c0_39 = arith.constant 0 : index
      %c0_40 = arith.constant 0 : index
      %53 = vector.load %arg7[%c0_39, %c0_40] : memref<1x1xf32, #tpu.memory_space<vmem>>, vector<1x1xf32>
      %54 = arith.divf %52, %53 : vector<1x1xf32>
      %cst_41 = arith.constant 0.000000e+00 : f32
      %55 = vector.broadcast %cst_41 : f32 to vector<1x1xf32>
      %56 = arith.subf %55, %54 : vector<1x1xf32>
      %c0_42 = arith.constant 0 : index
      %c0_43 = arith.constant 0 : index
      %57 = vector.load %arg4[%c0_42, %c0_43] : memref<1x1xf32, #tpu.memory_space<vmem>>, vector<1x1xf32>
      tpu.vector_store %arg4[%c0_42, %c0_43], %56 {strides = array<i32>} : memref<1x1xf32, #tpu.memory_space<vmem>>, vector<1x1xf32>,
    } else {
    }
    return
  }
  func.func @transform_0(%arg0: i32) -> (i32, i32) {
    %c0_i32 = arith.constant 0 : i32
    %c0_i32_0 = arith.constant 0 : i32
    %c0_i32_1 = arith.constant 0 : i32
    return %c0_i32, %c0_i32_0 : i32, i32
  }
  func.func @transform_1(%arg0: i32) -> (i32, i32) {
    %c0_i32 = arith.constant 0 : i32
    %c0_i32_0 = arith.constant 0 : i32
    %c0_i32_1 = arith.constant 0 : i32
    return %c0_i32, %c0_i32_0 : i32, i32
  }
  func.func @transform_2(%arg0: i32) -> (i32, i32, i32) {
    %c0_i32 = arith.constant 0 : i32
    %c0_i32_0 = arith.constant 0 : i32
    %c0_i32_1 = arith.constant 0 : i32
    return %c0_i32, %arg0, %c0_i32_0 : i32, i32, i32
  }
  func.func @transform_3(%arg0: i32) -> (i32, i32) {
    %c0_i32 = arith.constant 0 : i32
    %c0_i32_0 = arith.constant 0 : i32
    %c0_i32_1 = arith.constant 0 : i32
    return %c0_i32, %c0_i32_0 : i32, i32
  }
}

</mosaic_0001>

<bundles_post_ra>
// kernel: tpu_custom_call.1
= control target key start
LH: loop header
LB: loop body
LE: loop exit
PB: predicated region body
PF: predicated region fallthrough
CT: control target
= control target key end

     0   :  { %8 = vsyncpa [#allocation6], 0  ;;  %s414_s0 = inlined_call_operand.hbm [shape: f32[128,128], index: 0, kind: input, shape index: {}]   ;;  %s415_s1 = inlined_call_operand.hbm [shape: f32[8,8], index: 1, kind: input, shape index: {}]   ;;  %s416_s2 = inlined_call_operand.hbm [shape: f32[2,8,128], index: 2, kind: input, shape index: {}]   ;;  %s417_s3 = inlined_call_operand.hbm [shape: f32[1,1], index: 3, kind: output, shape index: {}]  }
   0x1   :  { %9 = vsyncpa [#allocation9], 0  ;;  %s29_s14 = sshll.u32 %s415_s1, 4  ;;  %s30_s14 = int_to_ptr.hbm [resolvable:$true] %s29_s14 }
   0x2   :  { %10 = vsyncpa [#allocation7], 0  ;;  %s361_s15 = smov [#allocation8]   ;;  %s15_s19 = sshll.u32 %s414_s0, 4  ;;  %s16_s19 = int_to_ptr.hbm [resolvable:$true] %s15_s19 }
   0x3   :  { %s31_s16 = sshll.u32 %s361_s15, 4  ;;  %s362_s20 = smov [#allocation5]   ;;  %s32_s16 = int_to_ptr.vmem [resolvable:$true] %s31_s16 }
   0x4   :  { %34 = dma.hbm_to_vmem [thread:$0]  %s30_s14, 128, %s32_s16, [#allocation9]  }
   0x5   :  { %s17_s21 = sshll.u32 %s362_s20, 4  ;;  %s363_s22 = smov 128   ;;  %s18_s21 = int_to_ptr.vmem [resolvable:$true] %s17_s21 }
   0x6   :  { %s364_s23 = smov 8   ;;  %s39_s1 = sshll.u32 %s416_s2, 4  ;;  %s40_s1 = int_to_ptr.hbm [resolvable:$true] %s39_s1 }
   0x7   :  { %23 = dma.hbm_to_vmem [thread:$0]  %s16_s19, 2048, %s18_s21, [#allocation6], %s363_s22, %s363_s22, %s364_s23  }
   0x8   :  { %s365_s26 = smov [#allocation10]  }
   0x9   :  { %s41_s27 = sshll.u32 %s365_s26, 4  ;;  %s42_s27 = int_to_ptr.vmem [resolvable:$true] %s41_s27 }
   0xa   :  { %47 = dma.hbm_to_vmem [thread:$0]  %s40_s1, 256, %s42_s27, [#allocation9], %s363_s22, %s363_s22, %s364_s23  }
   0xb   :  { %355 = dma.done.wait [#allocation6], 2048  }
   0xc   :  { %356 = vsyncadd [#allocation6], 4294965248 }
   0xd   :  { %357 = dma.done.wait [#allocation9], 384  }
   0xe   :  { %358 = vsyncadd [#allocation9], 4294966912  ;;  %v398_v0 = vld [vmem:[#allocation10] sm:$0xff]  ;;  %v89_v2 = vld [vmem:[#allocation8] sm:$0xff]  ;;  %vm90_vm0 = vcmask 64512   ;;  %vm64_vm1 = vcmask 0  }
   0xf   :  { %v71_v1 = vmul.f32 1.442695, %v398_v0  ;;  %v88_v4 = vld [vmem:[#allocation5 + $0x78] sm:$0xff]  ;;  %v87_v5 = vld [vmem:[#allocation5 + $0x70] sm:$0xff]  ;;  %v366_v6 = vmov 0.0   ;;  %v86_v7 = vld [vmem:[#allocation5 + $0x68] sm:$0xff] }
  0x10   :  { %126 = vmatpush.msra.mxu1 %v88_v4  ;;  %65 = vst.msk [vmem:[#allocation2] sm:$0x1] %vm64_vm1, %v366_v6  ;;  %v85_v8 = vld [vmem:[#allocation5 + $0x60] sm:$0xff]  ;;  %v84_v9 = vld [vmem:[#allocation5 + $0x58] sm:$0xff]  ;;  %v83_v10 = vld [vmem:[#allocation5 + $0x50] sm:$0xff]  ;;  %v367_v22 = vmov 0  }
  0x11   :  { %251 = vpow2.f32 %v71_v1  ;;  %66 = vst.msk [vmem:[#allocation3] sm:$0x1] %vm64_vm1, %v366_v6  ;;  %v82_v11 = vld [vmem:[#allocation5 + $0x48] sm:$0xff]  ;;  %v81_v12 = vld [vmem:[#allocation5 + $0x40] sm:$0xff]  ;;  %v80_v13 = vld [vmem:[#allocation5 + $0x38] sm:$0xff]  ;;  %249 = vset.pattern.permute.xlu0 %v367_v22  ;;  %s368_s0 = smov [#allocation11]  }
  0x12   :  { %127 = vmatpush.msra.mxu1 %v87_v5  ;;  %67 = vst.msk [vmem:[#allocation4] sm:$0x1] %vm64_vm1, %v366_v6  ;;  %v79_v14 = vld [vmem:[#allocation5 + $0x30] sm:$0xff]  ;;  %v78_v15 = vld [vmem:[#allocation5 + $0x28] sm:$0xff]  ;;  %v77_v16 = vld [vmem:[#allocation5 + $0x20] sm:$0xff]  ;;  %s227_s2 = sshll.u32 %s368_s0, 4  ;;  %s228_s2 = int_to_ptr.vmem [resolvable:$true] %s227_s2 }
  0x13   :  { %v76_v17 = vld [vmem:[#allocation5 + $0x18] sm:$0xff]  ;;  %v75_v18 = vld [vmem:[#allocation5 + $0x10] sm:$0xff]  ;;  %v74_v19 = vld [vmem:[#allocation5 + $0x8] sm:$0xff]  ;;  %s229_s30 = sshll.u32 %s417_s3, 4  ;;  %s230_s30 = int_to_ptr.hbm [resolvable:$true] %s229_s30 }
  0x14   :  { %128 = vmatpush.msra.mxu1 %v86_v7  ;;  %v73_v20 = vld [vmem:[#allocation5] sm:$0xff]  ;;  %v70_v23 = vld [vmem:[#allocation10 + $0x8] sm:$0xff] }
  0x15   :  { %vm163_vm2 = vcmp.eq.f32.partialorder %v70_v23, 1.0 }
  0x16   :  { %129 = vmatpush.msra.mxu1 %v85_v8  ;;  %v165_v24 = vsel %vm163_vm2, 1.0, %v366_v6 }
  0x17   :  { %v252_v3 = vpop.eup %251  ;;  %179 = vadd.xlane.f32.xlu1 %v165_v24  ;;  %v250_v25 = vld [vmem:[#allocation2] ss:$0 sm:$0xff] }
  0x18   :  { %109 = vmatpush.msra.mxu0 %v252_v3  ;;  %189 = vadd.xlane.f32.xlu2 %v252_v3  ;;  %v191_v60 = vld [vmem:[#allocation2] sm:$0x1] }
  0x19   :  { %240 = vmatmul.msk.f32.vlgmr.msra.gmra.mxu0 %vm90_vm0, %v89_v2  ;;  %130 = vmatpush.msra.mxu1 %v84_v9  ;;  %v178_v39 = vld [vmem:[#allocation4] sm:$0x1]  ;;  %v166_v9 = vld [vmem:[#allocation3] sm:$0x1] }
  0x1b   :  { %131 = vmatpush.msra.mxu1 %v83_v10 }
  0x1d   :  { %132 = vmatpush.msra.mxu1 %v82_v11 }
  0x1f   :  { %133 = vmatpush.msra.mxu1 %v81_v12 }
  0x21   :  { %134 = vmatpush.msra.mxu1 %v80_v13 }
  0x23   :  { %135 = vmatpush.msra.mxu1 %v79_v14 }
  0x25   :  { %136 = vmatpush.msra.mxu1 %v78_v15 }
  0x27   :  { %137 = vmatpush.msra.mxu1 %v77_v16 }
  0x29   :  { %138 = vmatpush.msra.mxu1 %v76_v17 }
  0x2b   :  { %139 = vmatpush.msra.mxu1 %v75_v18 }
  0x2d   :  { %140 = vmatpush.msra.mxu1 %v74_v19 }
  0x2f   :  { %141 = vmatpush.msra.mxu1 %v73_v20 }
  0x30   :  { %142 = vmatmul.f32.vlgmr.msra.gmra.mxu1 %v252_v3 }
  0x8a   :  { %v180_v30 = vpop.xlane.xlu1 %179 }
  0x8b   :  { %v181_v32 = vrot.slane %v180_v30, 4  ;;  %v190_v54 = vpop.xlane.xlu2 %189 }
  0x8c   :  { %v192_v55 = vrot.slane %v190_v54, 4 }
  0x8d   :  { %v182_v33 = vadd.f32 %v181_v32, %v180_v30 }
  0x8e   :  { %v193_v56 = vadd.f32 %v192_v55, %v190_v54 }
  0x8f   :  { %v183_v34 = vrot.slane %v182_v33, 2 }
  0x90   :  { %v194_v57 = vrot.slane %v193_v56, 2 }
  0x91   :  { %v184_v35 = vadd.f32 %v183_v34, %v182_v33 }
  0x92   :  { %v195_v58 = vadd.f32 %v194_v57, %v193_v56 }
  0x93   :  { %v185_v37 = vrot.slane %v184_v35, 1 }
  0x94   :  { %v196_v59 = vrot.slane %v195_v58, 1 }
  0x95   :  { %v186_v40 = vadd.f32 %v185_v37, %v184_v35 }
  0x96   :  { %v111_v21 = vpop.f32.mrf.mxu0  ;;  %v197_v61 = vadd.f32 %v196_v59, %v195_v58 }
  0x97   :  { %114 = vadd.xlane.f32.xlu0 %v111_v21  ;;  %v187_v41 = vadd.f32 %v186_v40, %v178_v39 }
  0x98   :  { %v198_v62 = vadd.f32 %v197_v61, %v191_v60 }
  0x99   :  { %188 = vst.msk [vmem:[#allocation4] sm:$0x1] %vm64_vm1, %v187_v41 }
  0x9a   :  { %199 = vst.msk [vmem:[#allocation2] sm:$0x1] %vm64_vm1, %v198_v62 }
  0xa0   :  { %v204_v63 = vld [vmem:[#allocation4] sm:$0x1] }
  0xa1   :  { %vm210_vm7 = vweird.f32 %v204_v63  ;;  %v216_v13 = vand.u32 2147483648, %v204_v63  ;;  %v214_v15 = vand.u32 2147483647, %v204_v63 }
  0xa3   :  { %v217_v16 = vor.u32 1.1754944e-38, %v216_v13  ;;  %vm215_vm10 = vcmp.eq.f32.partialorder %v214_v15, 8.507059e+37 }
  0xad   :  { %v143_v28 = vpop.f32.mrf.mxu1 }
 0x10a   :  { %v115_v26 = vpop.xlane.xlu0 %114 }
 0x10b   :  { %v120_v27 = vadd.f32 %v250_v25, %v115_v26 }
 0x10d   :  { %123 = vperm.xlu0 %249, %v120_v27  }
 0x17f   :  { %v124_v29 = vpop.permute.xlu0 %123 }
 0x180   :  { %v144_v31 = vadd.f32 %v143_v28, %v124_v29 }
 0x182   :  { %253 = vlog2.f32 %v144_v31 }
 0x188   :  { %v254_v36 = vpop.eup %253 }
 0x189   :  { %v147_v38 = vmul.f32 0.6931472, %v254_v36 }
 0x18b   :  { %255 = vrcp.f32 %v147_v38  ;;  %v159_v45 = vand.u32 2147483648, %v147_v38  ;;  %v157_v47 = vand.u32 2147483647, %v147_v38  ;;  %vm153_vm4 = vweird.f32 %v147_v38 }
 0x18c   :  { %257 = vrcp.f32 %v204_v63 }
 0x18d   :  { %v160_v49 = vor.u32 1.1754944e-38, %v159_v45  ;;  %vm158_vm6 = vcmp.eq.f32.partialorder %v157_v47, 8.507059e+37 }
 0x191   :  { %v256_v42 = vpop.eup %255 }
 0x192   :  { %v149_v43 = vmul.f32 %v256_v42, %v147_v38  ;;  %vm154_vm3 = vweird.f32 %v256_v42  ;;  %v258_v1 = vpop.eup %257 }
 0x193   :  { %vm155_vm5 = vmor %vm153_vm4, %vm154_vm3  ;;  %v206_v4 = vmul.f32 %v258_v1, %v204_v63  ;;  %vm211_vm8 = vweird.f32 %v258_v1 }
 0x194   :  { %v150_v44 = vsub.f32 1.0, %v149_v43  ;;  %vm212_vm9 = vmor %vm210_vm7, %vm211_vm8 }
 0x195   :  { %v207_v7 = vsub.f32 1.0, %v206_v4 }
 0x196   :  { %v151_v46 = vmul.f32 %v256_v42, %v150_v44 }
 0x197   :  { %v208_v11 = vmul.f32 %v258_v1, %v207_v7 }
 0x198   :  { %v152_v48 = vadd.f32 %v256_v42, %v151_v46 }
 0x199   :  { %v209_v14 = vadd.f32 %v258_v1, %v208_v11 }
 0x19a   :  { %v156_v50 = vsel %vm155_vm5, %v256_v42, %v152_v48 }
 0x19b   :  { %v161_v51 = vsel %vm158_vm6, %v160_v49, %v156_v50  ;;  %v213_v17 = vsel %vm212_vm9, %v258_v1, %v209_v14 }
 0x19c   :  { %v162_v52 = vmul.f32 %v161_v51, %v398_v0  ;;  %v218_v19 = vsel %vm215_vm10, %v217_v16, %v213_v17 }
 0x19e   :  { %v164_v53 = vsel %vm163_vm2, %v162_v52, 0.0 }
 0x19f   :  { %167 = vadd.xlane.f32.xlu1 %v164_v53 }
 0x212   :  { %v168_v2 = vpop.xlane.xlu1 %167 }
 0x213   :  { %v169_v3 = vrot.slane %v168_v2, 4 }
 0x215   :  { %v170_v0 = vadd.f32 %v169_v3, %v168_v2 }
 0x217   :  { %v171_v5 = vrot.slane %v170_v0, 2 }
 0x219   :  { %v172_v6 = vadd.f32 %v171_v5, %v170_v0 }
 0x21b   :  { %v173_v8 = vrot.slane %v172_v6, 1 }
 0x21d   :  { %v174_v10 = vadd.f32 %v173_v8, %v172_v6 }
 0x21f   :  { %v175_v12 = vadd.f32 %v174_v10, %v166_v9 }
 0x221   :  { %177 = vst.msk [vmem:[#allocation3] sm:$0x1] %vm64_vm1, %v175_v12 }
 0x228   :  { %v203_v18 = vld [vmem:[#allocation3] sm:$0x1] }
 0x229   :  { %v219_v20 = vmul.f32 %v218_v19, %v203_v18 }
 0x22b   :  { %v220_v21 = vsub.f32 0.0, %v219_v20 }
 0x22d   :  { %221 = vst.msk [vmem:[#allocation11] sm:$0x1] %vm64_vm1, %v220_v21 }
 0x22e   :  { %232 = dma.vmem_to_hbm [thread:$0]  %s228_s2, 16, %s230_s30, [#allocation7]  }
 0x22f   :  { %359 = dma.done.wait [#allocation7], 16  }
 0x230   :  { %360 = vsyncadd [#allocation7], 4294967280 }
 0x231   :  { %237 = vsyncpa [#allocation6], 1 }
 0x232   :  { %238 = vsyncpa [#allocation9], 1 }
 0x233   :  { %239 = vsyncpa [#allocation7], 1 }

</bundles_post_ra>
